<compile_context>
chip_gen: v6e
topology: v6e:2x2x1
jax: 0.10.0
libtpu: 0.0.40
codegen_flags: <defaults>
</compile_context>

<pallas_src>
import functools

import jax
import jax.numpy as jnp
from jax import lax
from jax.experimental import pallas as pl
from jax.experimental.pallas import tpu as pltpu


def _seqconv_kernel(x_ref, rk_ref, rb_ref, rc_ref, o_ref, *, H, W):
    # x_ref : (1, Cin, HWp)   one image, channel-major, flattened spatial on lanes
    # rk_ref: (Cout, 9*Cin)   reparameterized 3x3 weight, tap-major along K
    # rb_ref: (Cout, 1)       reparameterized bias
    # rc_ref: (2, HWp) int32  row / col index of each flattened pixel
    # o_ref : (1, Cout, HWp)
    x = x_ref[0]                                         # (Cin, HWp)
    rk = rk_ref[...]
    rb = rb_ref[...]
    row = rc_ref[0:1, :]                                 # (1, HWp)
    col = rc_ref[1:2, :]                                 # (1, HWp)
    HWp = x.shape[-1]

    # Nine shifted windows of zero-padded x, built with XLU lane rotations.
    # The border masks are load-bearing: they kill both out-of-image taps and
    # any wraparound the cyclic roll introduces.
    wins = []
    for dy in range(3):
        oy = dy - 1
        for dx in range(3):
            ox = dx - 1
            off = oy * W + ox
            if off == 0:
                wins.append(x)
                continue
            shifted = pltpu.roll(x, shift=(-off) % HWp, axis=1)
            valid = ((row + oy >= 0) & (row + oy < H)
                     & (col + ox >= 0) & (col + ox < W))
            wins.append(jnp.where(valid, shifted, 0.0))
    win_all = jnp.concatenate(wins, axis=0)              # (9*Cin, HWp)

    # Single fused 3x3 conv: (Cout, 9*Cin) @ (9*Cin, HWp) on the MXU, + RB once.
    y = jnp.dot(rk, win_all, preferred_element_type=jnp.float32) + rb
    o_ref[0] = y.astype(o_ref.dtype)                     # lane-dense store


def _round_up(v, m):
    return ((v + m - 1) // m) * m


def seqconv3x3_conv1x1_conv3x3(x_nchw, k0, b0, k1, b1, *, out_dtype=None):
    """x_nchw: (N, Cin, H, W); k0: (Cmid, Cin, 1, 1); b0: (Cmid,);
       k1: (Cout, Cmid, 3, 3); b1: (Cout,).  Returns (N, Cout, H, W).
       out_dtype: set to jnp.bfloat16 to halve HBM write traffic (looser tol)."""
    N, Cin, H, W = x_nchw.shape
    Cmid = k0.shape[0]
    Cout = k1.shape[0]
    HW = H * W
    HWp = _round_up(HW, 128)          # lane-dense output blocks
    out_dtype = x_nchw.dtype if out_dtype is None else out_dtype

    # ---- exact conv1x1 -> conv3x3 reparameterization (tiny, wrapper-side) ----
    k0m = k0.reshape(Cmid, Cin).astype(jnp.float32)
    k1f = k1.astype(jnp.float32)
    rk = jnp.einsum('omyx,mi->oiyx', k1f, k0m)                      # (Cout,Cin,3,3)
    rb = b1.astype(jnp.float32) + jnp.einsum('omyx,m->o', k1f,
                                             b0.astype(jnp.float32))
    # K ordering = (dy*3+dx)-major then ci -> matches the in-kernel concat.
    rk_mat = jnp.transpose(rk, (0, 2, 3, 1)).reshape(Cout, 9 * Cin)
    rb_col = rb.reshape(Cout, 1)

    # Channel-major / spatial-on-lanes repack (free reshape; pad lanes only if
    # H*W is not already a multiple of 128).
    x_flat = x_nchw.reshape(N, Cin, HW)
    if HWp != HW:
        x_flat = jnp.pad(x_flat, ((0, 0), (0, 0), (0, HWp - HW)))

    # Flattened-pixel (row, col) indices for the zero-border masks.
    pix = jnp.arange(HWp, dtype=jnp.int32)
    rc = jnp.stack([pix // W, pix % W], axis=0)                     # (2, HWp)

    kernel = functools.partial(_seqconv_kernel, H=H, W=W)

    flops = 2 * N * HW * 9 * Cin * Cout
    bytes_accessed = (4 * (N * Cin * HWp + N * Cout * HWp
                           + Cout * 9 * Cin + Cout) + 8 * HWp)

    # VMEM: double-buffered x/out blocks + (9*Cin, HWp) window + f32 result.
    need = 4 * HWp * (2 * Cin + 2 * Cout + 9 * Cin + Cout) + (1 << 20)
    vmem_limit = int(min(64 * (1 << 20), max(32 * (1 << 20), 2 * need)))

    out_flat = pl.pallas_call(
        kernel,
        out_shape=jax.ShapeDtypeStruct((N, Cout, HWp), out_dtype),
        grid=(N,),
        in_specs=[
            pl.BlockSpec((1, Cin, HWp), lambda n: (n, 0, 0)),
            pl.BlockSpec((Cout, 9 * Cin), lambda n: (0, 0)),
            pl.BlockSpec((Cout, 1), lambda n: (0, 0)),
            pl.BlockSpec((2, HWp), lambda n: (0, 0)),
        ],
        out_specs=pl.BlockSpec((1, Cout, HWp), lambda n: (n, 0, 0)),
        compiler_params=pltpu.CompilerParams(
            dimension_semantics=("parallel",),
            vmem_limit_bytes=vmem_limit),
        cost_estimate=pl.CostEstimate(
            flops=flops, transcendentals=0, bytes_accessed=bytes_accessed),
    )(x_flat, rk_mat, rb_col, rc)

    out = out_flat[:, :, :HW] if HWp != HW else out_flat
    return out.reshape(N, Cout, H, W)                    # free reshape


def _reference_forward(x, k0, b0, k1, b1):
    """Pure-JAX NCHW reference matching the PyTorch forward exactly."""
    dn = ("NCHW", "OIHW", "NCHW")
    y0 = lax.conv_general_dilated(x, k0, (1, 1), "VALID", dimension_numbers=dn)
    y0 = y0 + b0[None, :, None, None]
    y0 = jnp.pad(y0, ((0, 0), (0, 0), (1, 1), (1, 1)))
    b0p = b0[None, :, None, None]
    y0 = y0.at[:, :, 0:1, :].set(jnp.broadcast_to(b0p, y0[:, :, 0:1, :].shape))
    y0 = y0.at[:, :, -1:, :].set(jnp.broadcast_to(b0p, y0[:, :, -1:, :].shape))
    y0 = y0.at[:, :, :, 0:1].set(jnp.broadcast_to(b0p, y0[:, :, :, 0:1].shape))
    y0 = y0.at[:, :, :, -1:].set(jnp.broadcast_to(b0p, y0[:, :, :, -1:].shape))
    y1 = lax.conv_general_dilated(y0, k1, (1, 1), "VALID", dimension_numbers=dn)
    return y1 + b1[None, :, None, None]


if __name__ == "__main__":
    # SeqConv3x3('conv1x1-conv3x3', inp_planes=4, out_planes=4, depth_multiplier=2)
    N, Cin, H, W = 2, 4, 16, 16
    Cout = 4
    depth_multiplier = 2
    Cmid = int(Cout * depth_multiplier)

    key = jax.random.PRNGKey(0)
    kx, kk0, kb0, kk1, kb1 = jax.random.split(key, 5)

    x = jax.random.normal(kx, (N, Cin, H, W), dtype=jnp.float32)
    k0 = jax.random.normal(kk0, (Cmid, Cin, 1, 1), dtype=jnp.float32) * 0.1
    b0 = jax.random.normal(kb0, (Cmid,), dtype=jnp.float32) * 0.1
    k1 = jax.random.normal(kk1, (Cout, Cmid, 3, 3), dtype=jnp.float32) * 0.1
    b1 = jax.random.normal(kb1, (Cout,), dtype=jnp.float32) * 0.1

    y_pallas = jax.block_until_ready(seqconv3x3_conv1x1_conv3x3(x, k0, b0, k1, b1))
    y_ref = _reference_forward(x, k0, b0, k1, b1)

    assert y_pallas.shape == (N, Cout, H, W)
    max_err = float(jnp.max(jnp.abs(y_pallas - y_ref)))
    assert jnp.allclose(y_pallas, y_ref, atol=2e-4, rtol=2e-4), max_err

    print("KERNEL_OK")
</pallas_src>

<mosaic_0001>
module attributes {stable_mosaic.version = 11 : i64} {
  func.func @_seqconv_kernel(%arg0: i32, %arg1: memref<1x4x256xf32, #tpu.memory_space<vmem>>, %arg2: memref<4x36xf32, #tpu.memory_space<vmem>>, %arg3: memref<4x1xf32, #tpu.memory_space<vmem>>, %arg4: memref<2x256xi32, #tpu.memory_space<vmem>>, %arg5: memref<1x4x256xf32, #tpu.memory_space<vmem>>) attributes {dimension_semantics = [#tpu.dimension_semantics<parallel>], iteration_bounds = array<i64: 2>, scalar_prefetch = 0 : i64, scratch_operands = 0 : i64, tpu.core_type = #tpu.core_type<tc>, window_params = [{transform_indices = @transform_0, window_bounds = array<i64: 1, 4, 256>}, {pipeline_mode = #tpu.pipeline_mode<synchronous>, transform_indices = @transform_1, window_bounds = array<i64: 4, 36>}, {pipeline_mode = #tpu.pipeline_mode<synchronous>, transform_indices = @transform_2, window_bounds = array<i64: 4, 1>}, {pipeline_mode = #tpu.pipeline_mode<synchronous>, transform_indices = @transform_3, window_bounds = array<i64: 2, 256>}, {transform_indices = @transform_4, window_bounds = array<i64: 1, 4, 256>}]} {
    %c0 = arith.constant 0 : index
    %c0_0 = arith.constant 0 : index
    %c0_1 = arith.constant 0 : index
    %0 = vector.load %arg1[%c0, %c0_0, %c0_1] : memref<1x4x256xf32, #tpu.memory_space<vmem>>, vector<1x4x256xf32>
    %1 = vector.shape_cast %0 : vector<1x4x256xf32> to vector<4x256xf32>
    %c0_2 = arith.constant 0 : index
    %c0_3 = arith.constant 0 : index
    %2 = vector.load %arg2[%c0_2, %c0_3] : memref<4x36xf32, #tpu.memory_space<vmem>>, vector<4x36xf32>
    %c0_4 = arith.constant 0 : index
    %c0_5 = arith.constant 0 : index
    %3 = vector.load %arg3[%c0_4, %c0_5] : memref<4x1xf32, #tpu.memory_space<vmem>>, vector<4x1xf32>
    %c0_6 = arith.constant 0 : index
    %c0_7 = arith.constant 0 : index
    %4 = vector.load %arg4[%c0_6, %c0_7] : memref<2x256xi32, #tpu.memory_space<vmem>>, vector<1x256xi32>
    %c1 = arith.constant 1 : index
    %c0_8 = arith.constant 0 : index
    %5 = vector.load %arg4[%c1, %c0_8] : memref<2x256xi32, #tpu.memory_space<vmem>>, vector<1x256xi32>
    %c17_i32 = arith.constant 17 : i32
    %6 = tpu.dynamic_rotate %1 by %c17_i32 dim 1 : vector<4x256xf32>, i32 -> vector<4x256xf32>
    %c-1_i32 = arith.constant -1 : i32
    %7 = vector.broadcast %c-1_i32 : i32 to vector<1x256xi32>
    %8 = arith.addi %4, %7 : vector<1x256xi32>
    %c0_i32 = arith.constant 0 : i32
    %9 = vector.broadcast %c0_i32 : i32 to vector<1x256xi32>
    %10 = arith.cmpi sge, %8, %9 : vector<1x256xi32>
    %c-1_i32_9 = arith.constant -1 : i32
    %11 = vector.broadcast %c-1_i32_9 : i32 to vector<1x256xi32>
    %12 = arith.addi %4, %11 : vector<1x256xi32>
    %c16_i32 = arith.constant 16 : i32
    %13 = vector.broadcast %c16_i32 : i32 to vector<1x256xi32>
    %14 = arith.cmpi slt, %12, %13 : vector<1x256xi32>
    %15 = arith.andi %10, %14 : vector<1x256xi1>
    %c-1_i32_10 = arith.constant -1 : i32
    %16 = vector.broadcast %c-1_i32_10 : i32 to vector<1x256xi32>
    %17 = arith.addi %5, %16 : vector<1x256xi32>
    %c0_i32_11 = arith.constant 0 : i32
    %18 = vector.broadcast %c0_i32_11 : i32 to vector<1x256xi32>
    %19 = arith.cmpi sge, %17, %18 : vector<1x256xi32>
    %20 = arith.andi %15, %19 : vector<1x256xi1>
    %c-1_i32_12 = arith.constant -1 : i32
    %21 = vector.broadcast %c-1_i32_12 : i32 to vector<1x256xi32>
    %22 = arith.addi %5, %21 : vector<1x256xi32>
    %c16_i32_13 = arith.constant 16 : i32
    %23 = vector.broadcast %c16_i32_13 : i32 to vector<1x256xi32>
    %24 = arith.cmpi slt, %22, %23 : vector<1x256xi32>
    %25 = arith.andi %20, %24 : vector<1x256xi1>
    %cst = arith.constant 0.000000e+00 : f32
    %26 = vector.shape_cast %25 : vector<1x256xi1> to vector<1x256xi1>
    %27 = vector.broadcast %26 : vector<1x256xi1> to vector<4x256xi1>
    %28 = vector.broadcast %cst : f32 to vector<4x256xf32>
    %29 = arith.select %27, %6, %28 : vector<4x256xi1>, vector<4x256xf32>
    %c16_i32_14 = arith.constant 16 : i32
    %30 = tpu.dynamic_rotate %1 by %c16_i32_14 dim 1 : vector<4x256xf32>, i32 -> vector<4x256xf32>
    %c-1_i32_15 = arith.constant -1 : i32
    %31 = vector.broadcast %c-1_i32_15 : i32 to vector<1x256xi32>
    %32 = arith.addi %4, %31 : vector<1x256xi32>
    %c0_i32_16 = arith.constant 0 : i32
    %33 = vector.broadcast %c0_i32_16 : i32 to vector<1x256xi32>
    %34 = arith.cmpi sge, %32, %33 : vector<1x256xi32>
    %c-1_i32_17 = arith.constant -1 : i32
    %35 = vector.broadcast %c-1_i32_17 : i32 to vector<1x256xi32>
    %36 = arith.addi %4, %35 : vector<1x256xi32>
    %c16_i32_18 = arith.constant 16 : i32
    %37 = vector.broadcast %c16_i32_18 : i32 to vector<1x256xi32>
    %38 = arith.cmpi slt, %36, %37 : vector<1x256xi32>
    %39 = arith.andi %34, %38 : vector<1x256xi1>
    %c0_i32_19 = arith.constant 0 : i32
    %40 = vector.broadcast %c0_i32_19 : i32 to vector<1x256xi32>
    %41 = arith.addi %5, %40 : vector<1x256xi32>
    %c0_i32_20 = arith.constant 0 : i32
    %42 = vector.broadcast %c0_i32_20 : i32 to vector<1x256xi32>
    %43 = arith.cmpi sge, %41, %42 : vector<1x256xi32>
    %44 = arith.andi %39, %43 : vector<1x256xi1>
    %c0_i32_21 = arith.constant 0 : i32
    %45 = vector.broadcast %c0_i32_21 : i32 to vector<1x256xi32>
    %46 = arith.addi %5, %45 : vector<1x256xi32>
    %c16_i32_22 = arith.constant 16 : i32
    %47 = vector.broadcast %c16_i32_22 : i32 to vector<1x256xi32>
    %48 = arith.cmpi slt, %46, %47 : vector<1x256xi32>
    %49 = arith.andi %44, %48 : vector<1x256xi1>
    %cst_23 = arith.constant 0.000000e+00 : f32
    %50 = vector.shape_cast %49 : vector<1x256xi1> to vector<1x256xi1>
    %51 = vector.broadcast %50 : vector<1x256xi1> to vector<4x256xi1>
    %52 = vector.broadcast %cst_23 : f32 to vector<4x256xf32>
    %53 = arith.select %51, %30, %52 : vector<4x256xi1>, vector<4x256xf32>
    %c15_i32 = arith.constant 15 : i32
    %54 = tpu.dynamic_rotate %1 by %c15_i32 dim 1 : vector<4x256xf32>, i32 -> vector<4x256xf32>
    %c-1_i32_24 = arith.constant -1 : i32
    %55 = vector.broadcast %c-1_i32_24 : i32 to vector<1x256xi32>
    %56 = arith.addi %4, %55 : vector<1x256xi32>
    %c0_i32_25 = arith.constant 0 : i32
    %57 = vector.broadcast %c0_i32_25 : i32 to vector<1x256xi32>
    %58 = arith.cmpi sge, %56, %57 : vector<1x256xi32>
    %c-1_i32_26 = arith.constant -1 : i32
    %59 = vector.broadcast %c-1_i32_26 : i32 to vector<1x256xi32>
    %60 = arith.addi %4, %59 : vector<1x256xi32>
    %c16_i32_27 = arith.constant 16 : i32
    %61 = vector.broadcast %c16_i32_27 : i32 to vector<1x256xi32>
    %62 = arith.cmpi slt, %60, %61 : vector<1x256xi32>
    %63 = arith.andi %58, %62 : vector<1x256xi1>
    %c1_i32 = arith.constant 1 : i32
    %64 = vector.broadcast %c1_i32 : i32 to vector<1x256xi32>
    %65 = arith.addi %5, %64 : vector<1x256xi32>
    %c0_i32_28 = arith.constant 0 : i32
    %66 = vector.broadcast %c0_i32_28 : i32 to vector<1x256xi32>
    %67 = arith.cmpi sge, %65, %66 : vector<1x256xi32>
    %68 = arith.andi %63, %67 : vector<1x256xi1>
    %c1_i32_29 = arith.constant 1 : i32
    %69 = vector.broadcast %c1_i32_29 : i32 to vector<1x256xi32>
    %70 = arith.addi %5, %69 : vector<1x256xi32>
    %c16_i32_30 = arith.constant 16 : i32
    %71 = vector.broadcast %c16_i32_30 : i32 to vector<1x256xi32>
    %72 = arith.cmpi slt, %70, %71 : vector<1x256xi32>
    %73 = arith.andi %68, %72 : vector<1x256xi1>
    %cst_31 = arith.constant 0.000000e+00 : f32
    %74 = vector.shape_cast %73 : vector<1x256xi1> to vector<1x256xi1>
    %75 = vector.broadcast %74 : vector<1x256xi1> to vector<4x256xi1>
    %76 = vector.broadcast %cst_31 : f32 to vector<4x256xf32>
    %77 = arith.select %75, %54, %76 : vector<4x256xi1>, vector<4x256xf32>
    %c1_i32_32 = arith.constant 1 : i32
    %78 = tpu.dynamic_rotate %1 by %c1_i32_32 dim 1 : vector<4x256xf32>, i32 -> vector<4x256xf32>
    %c0_i32_33 = arith.constant 0 : i32
    %79 = vector.broadcast %c0_i32_33 : i32 to vector<1x256xi32>
    %80 = arith.addi %4, %79 : vector<1x256xi32>
    %c0_i32_34 = arith.constant 0 : i32
    %81 = vector.broadcast %c0_i32_34 : i32 to vector<1x256xi32>
    %82 = arith.cmpi sge, %80, %81 : vector<1x256xi32>
    %c0_i32_35 = arith.constant 0 : i32
    %83 = vector.broadcast %c0_i32_35 : i32 to vector<1x256xi32>
    %84 = arith.addi %4, %83 : vector<1x256xi32>
    %c16_i32_36 = arith.constant 16 : i32
    %85 = vector.broadcast %c16_i32_36 : i32 to vector<1x256xi32>
    %86 = arith.cmpi slt, %84, %85 : vector<1x256xi32>
    %87 = arith.andi %82, %86 : vector<1x256xi1>
    %c-1_i32_37 = arith.constant -1 : i32
    %88 = vector.broadcast %c-1_i32_37 : i32 to vector<1x256xi32>
    %89 = arith.addi %5, %88 : vector<1x256xi32>
    %c0_i32_38 = arith.constant 0 : i32
    %90 = vector.broadcast %c0_i32_38 : i32 to vector<1x256xi32>
    %91 = arith.cmpi sge, %89, %90 : vector<1x256xi32>
    %92 = arith.andi %87, %91 : vector<1x256xi1>
    %c-1_i32_39 = arith.constant -1 : i32
    %93 = vector.broadcast %c-1_i32_39 : i32 to vector<1x256xi32>
    %94 = arith.addi %5, %93 : vector<1x256xi32>
    %c16_i32_40 = arith.constant 16 : i32
    %95 = vector.broadcast %c16_i32_40 : i32 to vector<1x256xi32>
    %96 = arith.cmpi slt, %94, %95 : vector<1x256xi32>
    %97 = arith.andi %92, %96 : vector<1x256xi1>
    %cst_41 = arith.constant 0.000000e+00 : f32
    %98 = vector.shape_cast %97 : vector<1x256xi1> to vector<1x256xi1>
    %99 = vector.broadcast %98 : vector<1x256xi1> to vector<4x256xi1>
    %100 = vector.broadcast %cst_41 : f32 to vector<4x256xf32>
    %101 = arith.select %99, %78, %100 : vector<4x256xi1>, vector<4x256xf32>
    %c255_i32 = arith.constant 255 : i32
    %102 = tpu.dynamic_rotate %1 by %c255_i32 dim 1 : vector<4x256xf32>, i32 -> vector<4x256xf32>
    %c0_i32_42 = arith.constant 0 : i32
    %103 = vector.broadcast %c0_i32_42 : i32 to vector<1x256xi32>
    %104 = arith.addi %4, %103 : vector<1x256xi32>
    %c0_i32_43 = arith.constant 0 : i32
    %105 = vector.broadcast %c0_i32_43 : i32 to vector<1x256xi32>
    %106 = arith.cmpi sge, %104, %105 : vector<1x256xi32>
    %c0_i32_44 = arith.constant 0 : i32
    %107 = vector.broadcast %c0_i32_44 : i32 to vector<1x256xi32>
    %108 = arith.addi %4, %107 : vector<1x256xi32>
    %c16_i32_45 = arith.constant 16 : i32
    %109 = vector.broadcast %c16_i32_45 : i32 to vector<1x256xi32>
    %110 = arith.cmpi slt, %108, %109 : vector<1x256xi32>
    %111 = arith.andi %106, %110 : vector<1x256xi1>
    %c1_i32_46 = arith.constant 1 : i32
    %112 = vector.broadcast %c1_i32_46 : i32 to vector<1x256xi32>
    %113 = arith.addi %5, %112 : vector<1x256xi32>
    %c0_i32_47 = arith.constant 0 : i32
    %114 = vector.broadcast %c0_i32_47 : i32 to vector<1x256xi32>
    %115 = arith.cmpi sge, %113, %114 : vector<1x256xi32>
    %116 = arith.andi %111, %115 : vector<1x256xi1>
    %c1_i32_48 = arith.constant 1 : i32
    %117 = vector.broadcast %c1_i32_48 : i32 to vector<1x256xi32>
    %118 = arith.addi %5, %117 : vector<1x256xi32>
    %c16_i32_49 = arith.constant 16 : i32
    %119 = vector.broadcast %c16_i32_49 : i32 to vector<1x256xi32>
    %120 = arith.cmpi slt, %118, %119 : vector<1x256xi32>
    %121 = arith.andi %116, %120 : vector<1x256xi1>
    %cst_50 = arith.constant 0.000000e+00 : f32
    %122 = vector.shape_cast %121 : vector<1x256xi1> to vector<1x256xi1>
    %123 = vector.broadcast %122 : vector<1x256xi1> to vector<4x256xi1>
    %124 = vector.broadcast %cst_50 : f32 to vector<4x256xf32>
    %125 = arith.select %123, %102, %124 : vector<4x256xi1>, vector<4x256xf32>
    %c241_i32 = arith.constant 241 : i32
    %126 = tpu.dynamic_rotate %1 by %c241_i32 dim 1 : vector<4x256xf32>, i32 -> vector<4x256xf32>
    %c1_i32_51 = arith.constant 1 : i32
    %127 = vector.broadcast %c1_i32_51 : i32 to vector<1x256xi32>
    %128 = arith.addi %4, %127 : vector<1x256xi32>
    %c0_i32_52 = arith.constant 0 : i32
    %129 = vector.broadcast %c0_i32_52 : i32 to vector<1x256xi32>
    %130 = arith.cmpi sge, %128, %129 : vector<1x256xi32>
    %c1_i32_53 = arith.constant 1 : i32
    %131 = vector.broadcast %c1_i32_53 : i32 to vector<1x256xi32>
    %132 = arith.addi %4, %131 : vector<1x256xi32>
    %c16_i32_54 = arith.constant 16 : i32
    %133 = vector.broadcast %c16_i32_54 : i32 to vector<1x256xi32>
    %134 = arith.cmpi slt, %132, %133 : vector<1x256xi32>
    %135 = arith.andi %130, %134 : vector<1x256xi1>
    %c-1_i32_55 = arith.constant -1 : i32
    %136 = vector.broadcast %c-1_i32_55 : i32 to vector<1x256xi32>
    %137 = arith.addi %5, %136 : vector<1x256xi32>
    %c0_i32_56 = arith.constant 0 : i32
    %138 = vector.broadcast %c0_i32_56 : i32 to vector<1x256xi32>
    %139 = arith.cmpi sge, %137, %138 : vector<1x256xi32>
    %140 = arith.andi %135, %139 : vector<1x256xi1>
    %c-1_i32_57 = arith.constant -1 : i32
    %141 = vector.broadcast %c-1_i32_57 : i32 to vector<1x256xi32>
    %142 = arith.addi %5, %141 : vector<1x256xi32>
    %c16_i32_58 = arith.constant 16 : i32
    %143 = vector.broadcast %c16_i32_58 : i32 to vector<1x256xi32>
    %144 = arith.cmpi slt, %142, %143 : vector<1x256xi32>
    %145 = arith.andi %140, %144 : vector<1x256xi1>
    %cst_59 = arith.constant 0.000000e+00 : f32
    %146 = vector.shape_cast %145 : vector<1x256xi1> to vector<1x256xi1>
    %147 = vector.broadcast %146 : vector<1x256xi1> to vector<4x256xi1>
    %148 = vector.broadcast %cst_59 : f32 to vector<4x256xf32>
    %149 = arith.select %147, %126, %148 : vector<4x256xi1>, vector<4x256xf32>
    %c240_i32 = arith.constant 240 : i32
    %150 = tpu.dynamic_rotate %1 by %c240_i32 dim 1 : vector<4x256xf32>, i32 -> vector<4x256xf32>
    %c1_i32_60 = arith.constant 1 : i32
    %151 = vector.broadcast %c1_i32_60 : i32 to vector<1x256xi32>
    %152 = arith.addi %4, %151 : vector<1x256xi32>
    %c0_i32_61 = arith.constant 0 : i32
    %153 = vector.broadcast %c0_i32_61 : i32 to vector<1x256xi32>
    %154 = arith.cmpi sge, %152, %153 : vector<1x256xi32>
    %c1_i32_62 = arith.constant 1 : i32
    %155 = vector.broadcast %c1_i32_62 : i32 to vector<1x256xi32>
    %156 = arith.addi %4, %155 : vector<1x256xi32>
    %c16_i32_63 = arith.constant 16 : i32
    %157 = vector.broadcast %c16_i32_63 : i32 to vector<1x256xi32>
    %158 = arith.cmpi slt, %156, %157 : vector<1x256xi32>
    %159 = arith.andi %154, %158 : vector<1x256xi1>
    %c0_i32_64 = arith.constant 0 : i32
    %160 = vector.broadcast %c0_i32_64 : i32 to vector<1x256xi32>
    %161 = arith.addi %5, %160 : vector<1x256xi32>
    %c0_i32_65 = arith.constant 0 : i32
    %162 = vector.broadcast %c0_i32_65 : i32 to vector<1x256xi32>
    %163 = arith.cmpi sge, %161, %162 : vector<1x256xi32>
    %164 = arith.andi %159, %163 : vector<1x256xi1>
    %c0_i32_66 = arith.constant 0 : i32
    %165 = vector.broadcast %c0_i32_66 : i32 to vector<1x256xi32>
    %166 = arith.addi %5, %165 : vector<1x256xi32>
    %c16_i32_67 = arith.constant 16 : i32
    %167 = vector.broadcast %c16_i32_67 : i32 to vector<1x256xi32>
    %168 = arith.cmpi slt, %166, %167 : vector<1x256xi32>
    %169 = arith.andi %164, %168 : vector<1x256xi1>
    %cst_68 = arith.constant 0.000000e+00 : f32
    %170 = vector.shape_cast %169 : vector<1x256xi1> to vector<1x256xi1>
    %171 = vector.broadcast %170 : vector<1x256xi1> to vector<4x256xi1>
    %172 = vector.broadcast %cst_68 : f32 to vector<4x256xf32>
    %173 = arith.select %171, %150, %172 : vector<4x256xi1>, vector<4x256xf32>
    %c239_i32 = arith.constant 239 : i32
    %174 = tpu.dynamic_rotate %1 by %c239_i32 dim 1 : vector<4x256xf32>, i32 -> vector<4x256xf32>
    %c1_i32_69 = arith.constant 1 : i32
    %175 = vector.broadcast %c1_i32_69 : i32 to vector<1x256xi32>
    %176 = arith.addi %4, %175 : vector<1x256xi32>
    %c0_i32_70 = arith.constant 0 : i32
    %177 = vector.broadcast %c0_i32_70 : i32 to vector<1x256xi32>
    %178 = arith.cmpi sge, %176, %177 : vector<1x256xi32>
    %c1_i32_71 = arith.constant 1 : i32
    %179 = vector.broadcast %c1_i32_71 : i32 to vector<1x256xi32>
    %180 = arith.addi %4, %179 : vector<1x256xi32>
    %c16_i32_72 = arith.constant 16 : i32
    %181 = vector.broadcast %c16_i32_72 : i32 to vector<1x256xi32>
    %182 = arith.cmpi slt, %180, %181 : vector<1x256xi32>
    %183 = arith.andi %178, %182 : vector<1x256xi1>
    %c1_i32_73 = arith.constant 1 : i32
    %184 = vector.broadcast %c1_i32_73 : i32 to vector<1x256xi32>
    %185 = arith.addi %5, %184 : vector<1x256xi32>
    %c0_i32_74 = arith.constant 0 : i32
    %186 = vector.broadcast %c0_i32_74 : i32 to vector<1x256xi32>
    %187 = arith.cmpi sge, %185, %186 : vector<1x256xi32>
    %188 = arith.andi %183, %187 : vector<1x256xi1>
    %c1_i32_75 = arith.constant 1 : i32
    %189 = vector.broadcast %c1_i32_75 : i32 to vector<1x256xi32>
    %190 = arith.addi %5, %189 : vector<1x256xi32>
    %c16_i32_76 = arith.constant 16 : i32
    %191 = vector.broadcast %c16_i32_76 : i32 to vector<1x256xi32>
    %192 = arith.cmpi slt, %190, %191 : vector<1x256xi32>
    %193 = arith.andi %188, %192 : vector<1x256xi1>
    %cst_77 = arith.constant 0.000000e+00 : f32
    %194 = vector.shape_cast %193 : vector<1x256xi1> to vector<1x256xi1>
    %195 = vector.broadcast %194 : vector<1x256xi1> to vector<4x256xi1>
    %196 = vector.broadcast %cst_77 : f32 to vector<4x256xf32>
    %197 = arith.select %195, %174, %196 : vector<4x256xi1>, vector<4x256xf32>
    %198 = tpu.concatenate %29, %53, %77, %101, %1, %125, %149, %173, %197 in 0 : vector<4x256xf32>, vector<4x256xf32>, vector<4x256xf32>, vector<4x256xf32>, vector<4x256xf32>, vector<4x256xf32>, vector<4x256xf32>, vector<4x256xf32>, vector<4x256xf32> -> vector<36x256xf32>
    %cst_78 = arith.constant dense<0.000000e+00> : vector<4x256xf32>
    %199 = tpu.matmul %2, %198, %cst_78 {dimension_numbers = #tpu.dot_dimension_numbers<[1], [0], [0], [1], [0, 0, 1, 1], [], []>} : vector<4x36xf32>, vector<36x256xf32>, vector<4x256xf32> -> vector<4x256xf32>
    %200 = vector.broadcast %3 : vector<4x1xf32> to vector<4x256xf32>
    %201 = arith.addf %199, %200 : vector<4x256xf32>
    %c0_79 = arith.constant 0 : index
    %c0_80 = arith.constant 0 : index
    %c0_81 = arith.constant 0 : index
    %202 = vector.load %arg5[%c0_79, %c0_80, %c0_81] : memref<1x4x256xf32, #tpu.memory_space<vmem>>, vector<1x4x256xf32>
    %203 = vector.shape_cast %202 : vector<1x4x256xf32> to vector<4x256xf32>
    %204 = vector.shape_cast %201 : vector<4x256xf32> to vector<1x4x256xf32>
    tpu.vector_store %arg5[%c0_79, %c0_80, %c0_81], %204 {strides = array<i32>} : memref<1x4x256xf32, #tpu.memory_space<vmem>>, vector<1x4x256xf32>,
    return
  }
  func.func @transform_0(%arg0: i32) -> (i32, i32, i32) {
    %c0_i32 = arith.constant 0 : i32
    %c0_i32_0 = arith.constant 0 : i32
    %c0_i32_1 = arith.constant 0 : i32
    return %arg0, %c0_i32, %c0_i32_0 : i32, i32, i32
  }
  func.func @transform_1(%arg0: i32) -> (i32, i32) {
    %c0_i32 = arith.constant 0 : i32
    %c0_i32_0 = arith.constant 0 : i32
    %c0_i32_1 = arith.constant 0 : i32
    return %c0_i32, %c0_i32_0 : i32, i32
  }
  func.func @transform_2(%arg0: i32) -> (i32, i32) {
    %c0_i32 = arith.constant 0 : i32
    %c0_i32_0 = arith.constant 0 : i32
    %c0_i32_1 = arith.constant 0 : i32
    return %c0_i32, %c0_i32_0 : i32, i32
  }
  func.func @transform_3(%arg0: i32) -> (i32, i32) {
    %c0_i32 = arith.constant 0 : i32
    %c0_i32_0 = arith.constant 0 : i32
    %c0_i32_1 = arith.constant 0 : i32
    return %c0_i32, %c0_i32_0 : i32, i32
  }
  func.func @transform_4(%arg0: i32) -> (i32, i32, i32) {
    %c0_i32 = arith.constant 0 : i32
    %c0_i32_0 = arith.constant 0 : i32
    %c0_i32_1 = arith.constant 0 : i32
    return %arg0, %c0_i32, %c0_i32_0 : i32, i32, i32
  }
}

</mosaic_0001>

<bundles_post_ra>
// kernel: tpu_custom_call.1
= control target key start
LH: loop header
LB: loop body
LE: loop exit
PB: predicated region body
PF: predicated region fallthrough
CT: control target
= control target key end

     0   :  { %9 = vsyncpa [#allocation3], 0  ;;  %s1241_s0 = inlined_call_operand.hbm [shape: f32[2,4,256], index: 0, kind: input, shape index: {}]   ;;  %s1242_s1 = inlined_call_operand.vmem [shape: f32[4,36], index: 1, kind: input, shape index: {}]   ;;  %s1243_s2 = inlined_call_operand.vmem [shape: f32[4,1], index: 2, kind: input, shape index: {}]   ;;  %s1244_s3 = inlined_call_operand.vmem [shape: s32[2,256], index: 3, kind: input, shape index: {}]   ;;  %s1245_s4 = inlined_call_operand.hbm [shape: f32[2,4,256], index: 4, kind: output, shape index: {}]  }
   0x1   :  { %11 = vsyncpa [#allocation3 + $0x1], 0 }
   0x2   :  { %12 = vsyncpa [#allocation4], 0 }
   0x3   :  { %14 = vsyncpa [#allocation4 + $0x1], 0  ;;  %s838_s15 = smov 0   ;;  %s840_s16 = smov 0  }
   0x4   :  { %s842_s17 = smov 0   ;;  %s844_s18 = smov 0  }
   0x5 LB: > { %s859_s19 = sadd.s32 4294967295, %s799_s18   ;;  %s629_s20 = sadd.s32 4294967294, %s799_s18   ;;  %s799_s18 = sphi %s844_s18, %s1300_s18   ;;  %s795_s17 = sphi %s842_s17, %s1299_s17   ;;  %s791_s16 = sphi %s840_s16, %s1298_s16   ;;  %s787_s15 = sphi %s838_s15, %s1297_s15  }
   0x6   : > { %s863_s21 = sadd.s32 1, %s799_s18   ;;  %s27_s22 = sadd.s32 1, %s795_s17 }
   0x7   : > { %s24_s23 = ssub.s32 %s799_s18, %s863_s21  ;;  %p34_p0 = scmp.ne.s32.totalorder %s795_s17, %s791_s16 }
   0x8   : > { %p25_p1 = scmp.eq.s32.totalorder %s24_s23, 0  ;;  %p35_p2 = scmp.eq.s32.totalorder %s799_s18, 0 }
   0x9   : > { %p40_p3 = scmp.ne.s32.totalorder %s791_s16, %s787_s15  ;;  %p41_p4 = scmp.eq.s32.totalorder %s859_s19, 0 }
   0xa   : > { %s875_s24 = scalar_select %p25_p1, %s795_s17, %s27_s22  }
   0xb   : > { %p877_p5 = por %p35_p2, %p34_p0  ;;  %p881_p6 = por %p41_p4, %p40_p3 }
   0xc   : > { %p127_p7 = scmp.eq.s32.totalorder %s859_s19, 1  ;;  %p133_p8 = scmp.eq.s32.totalorder %s629_s20, 1 }
   0xd   : > { %s1250_s26 = scalar_select %p881_p6, 1, 0 }
   0xe   : > { %p661_p10 = scmp.lt.s32.totalorder %s799_s18, 2  ;;  %p888_p11 = por %p127_p7, %p34_p0 }
   0xf   : > { %p892_p12 = por %p133_p8, %p40_p3  ;;  %s162_s29 = sand.u32 1, %s795_s17  }
  0x10   : > { %s1251_s27 = scalar_select %p888_p11, 1, 0 }
  0x11   : > { %s1252_s28 = scalar_select %p892_p12, 1, 0 }
  0x12   : > { %s647_s30 = sshll.u32 %s799_s18, 7  ;;  %s632_s5 = sshll.u32 %s162_s29, 3 }
  0x13   : > { %s901_s8 = scalar_lea.hbm %s1241_s0, %s647_s30  ;;  %s166_s9 = scalar_lea.vmem [#allocation2], %s632_s5 }
  0x14   : > { %s174_s10 = sshll.u32 %s166_s9, 4  ;;  %p905_p13 = pnand %p661_p10, %p877_p5  ;;  %s909_s10 = int_to_ptr.vmem [resolvable:$true] %s174_s10 }
  0x15   : > { %s163_s12 = scalar_lea.sflag [#allocation3], %s162_s29  ;;  %s707_s13 = scalar_lea.hbm %s901_s8, 128 }
  0x16   : > { %p708_p2 = scmp.ne.s32.totalorder %s901_s8, %s707_s13  ;;  %p709_p3 = pneg %p905_p13 }
  0x17   : > { %s712_s22 = scalar_lea.hbm %s1241_s0, 256  ;;  %p713_p5 = scmp.lt.s32.totalorder %s901_s8, %s1241_s0 }
  0x18   : > { %p710_p4 = pnand %p709_p3, %p708_p2  ;;  %p714_p8 = scmp.lt.s32.totalorder %s712_s22, %s707_s13 }
  0x1a   : > { %p711_p7 = pneg %p710_p4  ;;  %p715_p10 = por %p714_p8, %p713_p5 }
  0x1c   : > { %p716_p9 = pnand %p715_p10, %p711_p7 }
  0x1e   : > { %719 = shalt.err (!%p716_p9)
}
  0x1f   : > { %s720_s29 = scalar_lea.vmem %s909_s10, 128  ;;  %s801_s30 = smov [#allocation2]  }
  0x20   : > { %p721_p0 = scmp.ne.s32.totalorder %s909_s10, %s720_s29  ;;  %s725_s5 = sshll.u32 %s801_s30, 4  ;;  %s726_s5 = int_to_ptr.vmem [resolvable:$false] %s725_s5 }
  0x21   : > { %s727_s6 = scalar_lea.vmem %s726_s5, 256  ;;  %p728_p4 = scmp.lt.s32.totalorder %s909_s10, %s726_s5 }
  0x22   : > { %p723_p1 = pnand %p721_p0, %p709_p3  ;;  %p729_p12 = scmp.lt.s32.totalorder %s727_s6, %s720_s29 }
  0x24   : > { %p724_p2 = pneg %p723_p1  ;;  %p730_p11 = por %p729_p12, %p728_p4 }
  0x26   : > { %p731_p6 = pnand %p730_p11, %p724_p2 }
  0x28   : > { %734 = shalt.err (!%p731_p6)
}
  0x29   : > { %656 = dma.hbm_to_vmem [thread:$0]  (!%p905_p13), %s901_s8, 128, %s909_s10, %s163_s12  }
  0x2a   : > { %p1254_p9 = scmp.lt.s32.totalorder %s799_s18, 3  ;;  %p1255_p7 = scmp.ge.s32.totalorder %s799_s18, 1 }
  0x2c   : > { %p180_p0 = pnand %p1255_p7, %p1254_p9 }
  0x2d   : > { %s936_s7 = sand.u32 (!%p180_p0), 1, %s791_s16   ;;  %p1256_p6 = scmp.ne.s32.totalorder (!%p180_p0), %s1250_s26, 0 }
  0x2e   : > { %183 = sbr.rel (%p180_p0) target bundleno = 414 (0x19e), region = 36  ;;  %s636_s9 = sshll.u32 (!%p180_p0), %s936_s7, 3 }
  0x2f   : > { %s186_s13 = scalar_lea.sflag (!%p180_p0), [#allocation3], %s936_s7  ;;  %s189_s11 = scalar_lea.vmem (!%p180_p0), [#allocation2], %s636_s9 }
  0x33   : > { %778 = dma.done.wait (%p1256_p6), %s186_s13, 128  }
  0x34   : > { %780 = vsyncadd (%p1256_p6), %s186_s13, 4294967168  ;;  %v802_v0 = vmov 0   ;;  %v947_v1 = vld [vmem:[%s189_s11] sm:$0xff]  ;;  %s803_s8 = smov 111   ;;  %s804_s10 = smov 112   ;;  %v808_v3 = vmov 0.0   ;;  %v227_v10 = vlaneseq }
  0x35   : > { %705 = vset.pattern.permute.xlu0 %v802_v0  ;;  %398 = vrot.lane.b32.xlu1 %v947_v1, %s803_s8  ;;  %v953_v2 = vcombine.high %v947_v1, %v947_v1  ;;  %s805_s12 = smov 127   ;;  %s806_s26 = smov 113   ;;  %v216_v4 = vld [vmem:[%s1243_s2] sm:$0xf] }
  0x36   : > { %376 = vrot.lane.b32.xlu0 %v947_v1, %s804_s10  ;;  %s807_s14 = smov 1   ;;  %532 = vmatprep.mubr.f32.mxu0 %v808_v3  ;;  %s809_s20 = smov 16   ;;  %v217_v5 = vld [vmem:[%s1244_s3] ss:$2 sm:$0x3]  ;;  %v243_v13 = vshrl.u32 %v227_v10, 7 }
  0x37   : > { %s810_s22 = smov 15   ;;  %s811_s23 = smov 17   ;;  %v978_v6 = vld [vmem:[%s1244_s3 + $0x1] ss:$2 sm:$0x3]  ;;  %v357_v7 = vadd.s32 1, %v217_v5 }
  0x38   : > { %v981_v8 = vadd.s32 1, %v978_v6  ;;  %vm310_vm4 = vcmp.ge.s32.totalorder %v217_v5, 0  ;;  %vm311_vm5 = vcmp.lt.s32.totalorder %v217_v5, 16  ;;  %vm261_vm9 = vcmp.ge.s32.totalorder %v978_v6, 0  ;;  %p1294_p12 = scmp.ne.s32.totalorder %s1251_s27, 0  ;;  %s812_s29 = smov [#allocation5]  }
  0x39   : > { %400 = vrot.lane.b32.xlu1 %v953_v2, %s803_s8  ;;  %vm358_vm0 = vcmp.ge.s32.totalorder %v357_v7, 0  ;;  %vm359_vm1 = vcmp.lt.s32.totalorder %v357_v7, 16  ;;  %vm993_vm8 = vmand %vm310_vm4, %vm311_vm5  ;;  %v999_v12 = vadd.s32 4294967295, %v978_v6  ;;  %vm263_vm12 = vcmp.lt.s32.totalorder %v978_v6, 16 }
  0x3a   : > { %328 = vrot.lane.b32.xlu0 %v947_v1, %s805_s12  ;;  %vm286_vm2 = vcmp.ge.s32.totalorder %v981_v8, 0  ;;  %vm984_vm3 = vmand %vm358_vm0, %vm359_vm1  ;;  %vm288_vm6 = vcmp.lt.s32.totalorder %v981_v8, 16  ;;  %v1013_v14 = vsub.s32 1, %v243_v13  ;;  %v1015_v15 = vsub.s32 0, %v243_v13 }
  0x3b   : > { %vm405_vm7 = vmand %vm984_vm3, %vm286_vm2  ;;  %vm1248_vm14 = vcmp.ge.s32.totalorder %v999_v12, 0  ;;  %vm239_vm1 = vcmp.lt.s32.totalorder %v999_v12, 16  ;;  %v1027_v17 = vand.u32 127, %v227_v10  ;;  %v232_v18 = vadd.s32 4294967295, %v217_v5 }
  0x3c   : > { %vm406_vm10 = vmand %vm405_vm7, %vm288_vm6 }
  0x3d   : > { %330 = vrot.lane.b32.xlu1 %v953_v2, %s805_s12  ;;  %vm335_vm11 = vmand %vm993_vm8, %vm286_vm2  ;;  %v407_v16 = vsel %vm406_vm10, 1, %v802_v0  ;;  %vm402_vm7 = vcmp.lt.s32.totalorder %v1027_v17, 111  ;;  %vm233_vm10 = vcmp.ge.s32.totalorder %v232_v18, 0  ;;  %s213_s12 = scalar_lea.vmem [#allocation5], %s636_s9 }
  0x3e   : > { %378 = vrot.lane.b32.xlu0 %v953_v2, %s804_s10  ;;  %vm383_vm13 = vmand %vm984_vm3, %vm261_vm9  ;;  %v415_v19 = vrot.slane %v407_v16, %v1013_v14  ;;  %v411_v20 = vrot.slane %v407_v16, %v1015_v15  ;;  %s648_s10 = sshll.u32 %s859_s19, 7  ;;  %s739_s19 = sshll.u32 %s812_s29, 4  ;;  %s740_s19 = int_to_ptr.vmem [resolvable:$false] %s739_s19 }
  0x3f   : > { %vm336_vm15 = vmand %vm335_vm11, %vm288_vm6  ;;  %vm234_vm11 = vcmp.lt.s32.totalorder %v232_v18, 16  ;;  %s741_s9 = scalar_lea.vmem %s740_s19, 256 }
  0x40   : > { %vm384_vm0 = vmand %vm383_vm13, %vm263_vm12  ;;  %v337_v21 = vsel %vm336_vm15, 1, %v802_v0  ;;  %vm1041_vm13 = vcmp.eq.s32.totalorder %v415_v19, 1  ;;  %vm1045_vm15 = vcmp.eq.s32.totalorder %v411_v20, 1 }
  0x41   : > { %352 = vrot.lane.b32.xlu1 %v953_v2, %s806_s26  ;;  %vm361_vm4 = vmand %vm984_vm3, %vm1248_vm14  ;;  %v385_v24 = vsel %vm384_vm0, 1, %v802_v0  ;;  %v345_v25 = vrot.slane %v337_v21, %v1013_v14  ;;  %v341_v32 = vrot.slane %v337_v21, %v1015_v15 }
  0x42   : > { %350 = vrot.lane.b32.xlu0 %v947_v1, %s806_s26  ;;  %vm362_vm5 = vmand %vm361_vm4, %vm239_vm1  ;;  %v389_v28 = vrot.slane %v385_v24, %v1015_v15  ;;  %v393_v29 = vrot.slane %v385_v24, %v1013_v14  ;;  %vm332_vm4 = vcmp.lt.s32.totalorder %v1027_v17, 127  ;;  %s559_s26 = sshll.u32 %s213_s12, 4  ;;  %s560_s26 = int_to_ptr.vmem [resolvable:$true] %s559_s26 }
  0x43   : > { %vm313_vm3 = vmand %vm993_vm8, %vm1248_vm14  ;;  %vm444_vm8 = vcmask 1043456   ;;  %v363_v33 = vsel %vm362_vm5, 1, %v802_v0  ;;  %vm1069_vm5 = vcmp.eq.s32.totalorder %v345_v25, 1  ;;  %s735_s25 = scalar_lea.vmem %s560_s26, 128  ;;  %p742_p3 = scmp.lt.s32.totalorder %s560_s26, %s740_s19 }
  0x44   : > { %vm1055_vm0 = vmand %vm313_vm3, %vm239_vm1  ;;  %vm380_vm3 = vcmp.lt.s32.totalorder %v1027_v17, 112  ;;  %v367_v43 = vrot.slane %v363_v33, %v1015_v15  ;;  %v371_v44 = vrot.slane %v363_v33, %v1013_v14  ;;  %p736_p11 = scmp.ne.s32.totalorder %s560_s26, %s735_s25  ;;  %p743_p5 = scmp.lt.s32.totalorder %s741_s9, %s735_s25 }
  0x45   : > { %305 = vrot.lane.b32.xlu1 %v953_v2, %s807_s14  ;;  %vm1061_vm14 = vmand %vm233_vm10, %vm234_vm11  ;;  %vm1079_vm10 = vcmp.eq.s32.totalorder %v393_v29, 1  ;;  %vm1086_vm11 = vcmp.eq.s32.totalorder %v341_v32, 1  ;;  %v315_v48 = vsel %vm1055_vm0, 1, %v802_v0 }
  0x46   : > { %303 = vrot.lane.b32.xlu0 %v947_v1, %s807_s14  ;;  %vm1114_vm0 = vcmp.eq.s32.totalorder %v367_v43, 1  ;;  %v319_v62 = vrot.slane %v315_v48, %v1015_v15  ;;  %v323_v11 = vrot.slane %v315_v48, %v1013_v14  ;;  %p737_p13 = pnand %p736_p11, %p1294_p12  ;;  %p744_p8 = por %p743_p5, %p742_p3 }
  0x48   : > { %p738_p1 = pneg %p737_p13 }
  0x49   : > { %256 = vrot.lane.b32.xlu1 %v953_v2, %s809_s20 }
  0x4a   : > { %254 = vrot.lane.b32.xlu0 %v947_v1, %s809_s20  ;;  %p745_p10 = pnand %p744_p8, %p738_p1 }
  0x4d   : > { %280 = vrot.lane.b32.xlu1 %v953_v2, %s810_s22 }
  0x4e   : > { %278 = vrot.lane.b32.xlu0 %v947_v1, %s810_s22  ;;  %s557_s22 = scalar_lea.hbm %s1245_s4, %s648_s10 }
  0x51   : > { %225 = vrot.lane.b32.xlu1 %v953_v2, %s811_s23 }
  0x52   : > { %223 = vrot.lane.b32.xlu0 %v947_v1, %s811_s23  ;;  %s545_s23 = scalar_lea.sflag [#allocation4], %s936_s7 }
  0x56   : > { %455 = vperm.xlu0 %705, %v216_v4  }
  0xa7   : > { %v399_v22 = vpop.permute.xlu1 %398 }
  0xa8   : > { %v377_v23 = vpop.permute.xlu0 %376 }
  0xab   : > { %v401_v31 = vpop.permute.xlu1 %400 }
  0xac   : > { %v329_v30 = vpop.permute.xlu0 %328  ;;  %v403_v35 = vsel %vm402_vm7, %v399_v22, %v401_v31  ;;  %v404_v36 = vsel %vm402_vm7, %v401_v31, %v399_v22  ;;  %vm1075_vm7 = vcmp.eq.s32.totalorder %v389_v28, 1 }
  0xad   : > { %v419_v38 = vsel %vm1041_vm13, %v404_v36, 0.0  ;;  %v418_v39 = vsel %vm1045_vm15, %v403_v35, 0.0  ;;  %vm262_vm13 = vmand %vm1061_vm14, %vm261_vm9  ;;  %vm354_vm9 = vcmp.lt.s32.totalorder %v1027_v17, 113 }
  0xae   : > { %639 = vmatprep.subr.msk.mxu0 %vm444_vm8, %v419_v38  ;;  %vm287_vm15 = vmand %vm1061_vm14, %vm286_vm2 }
  0xaf   : > { %640 = vmatpush1.msk.msra.mxu0 %vm444_vm8, %v418_v39  ;;  %v331_v46 = vpop.permute.xlu1 %330  ;;  %vm264_vm2 = vmand %vm262_vm13, %vm263_vm12  ;;  %vm1281_vm12 = vcmp.ge.s32.totalorder %v999_v12, 0 }
  0xb0   : > { %v379_v47 = vpop.permute.xlu0 %378  ;;  %v333_v49 = vsel %vm332_vm4, %v329_v30, %v331_v46  ;;  %v334_v50 = vsel %vm332_vm4, %v331_v46, %v329_v30  ;;  %vm1118_vm4 = vcmp.eq.s32.totalorder %v371_v44, 1  ;;  %v265_v10 = vsel %vm264_vm2, 1, %v802_v0 }
  0xb1   : > { %v381_v51 = vsel %vm380_vm3, %v377_v23, %v379_v47  ;;  %v382_v52 = vsel %vm380_vm3, %v379_v47, %v377_v23  ;;  %v349_v53 = vsel %vm1069_vm5, %v334_v50, 0.0  ;;  %v348_v56 = vsel %vm1086_vm11, %v333_v49, 0.0  ;;  %vm289_vm5 = vmand %vm287_vm15, %vm288_vm6 }
  0xb2   : > { %v396_v54 = vsel %vm1075_vm7, %v381_v51, 0.0  ;;  %v397_v55 = vsel %vm1079_vm10, %v382_v52, 0.0  ;;  %v435_v59 = vrot.slane %v349_v53, 4  ;;  %v434_v7 = vrot.slane %v348_v56, 4  ;;  %vm238_vm3 = vmand %vm1061_vm14, %vm1281_vm12 }
  0xb3   : > { %v353_v60 = vpop.permute.xlu1 %352  ;;  %v440_v63 = vrot.slane %v396_v54, 4  ;;  %v441_v3 = vrot.slane %v397_v55, 4  ;;  %v290_v16 = vsel %vm289_vm5, 1, %v802_v0  ;;  %vm307_vm6 = vcmp.lt.s32.totalorder %v1027_v17, 1  ;;  %vm240_vm14 = vmand %vm238_vm3, %vm239_vm1 }
  0xb4   : > { %v351_v61 = vpop.permute.xlu0 %350  ;;  %v450_v20 = vsel %vm444_vm8, %v953_v2, %v435_v59  ;;  %v269_v21 = vrot.slane %v265_v10, %v1015_v15  ;;  %v273_v22 = vrot.slane %v265_v10, %v1013_v14  ;;  %v449_v23 = vsel %vm444_vm8, %v947_v1, %v434_v7  ;;  %v215_v59 = vld [vmem:[%s1242_s1] sm:$0xf] }
  0xb5   : > { %v355_v4 = vsel %vm354_vm9, %v351_v61, %v353_v60  ;;  %v356_v5 = vsel %vm354_vm9, %v353_v60, %v351_v61  ;;  %v294_v24 = vrot.slane %v290_v16, %v1015_v15  ;;  %v298_v25 = vrot.slane %v290_v16, %v1013_v14 }
  0xb6   : > { %v374_v9 = vsel %vm1114_vm0, %v355_v4, 0.0  ;;  %v375_v6 = vsel %vm1118_vm4, %v356_v5, 0.0  ;;  %vm1151_vm7 = vcmp.eq.s32.totalorder %v319_v62, 1  ;;  %vm1155_vm10 = vcmp.eq.s32.totalorder %v323_v11, 1 }
  0xb7   : > { %v452_v8 = vsel %vm444_vm8, %v375_v6, %v441_v3  ;;  %v451_v13 = vsel %vm444_vm8, %v374_v9, %v440_v63  ;;  %v306_v18 = vpop.permute.xlu1 %305  ;;  %vm258_vm1 = vcmp.lt.s32.totalorder %v1027_v17, 16  ;;  %v241_v1 = vsel %vm240_vm14, 1, %v802_v0 }
  0xb8   : > { %492 = vmatprep.subr.mxu0 %v452_v8  ;;  %v304_v19 = vpop.permute.xlu0 %303  ;;  %vm1161_vm11 = vcmp.eq.s32.totalorder %v269_v21, 1  ;;  %vm1165_vm13 = vcmp.eq.s32.totalorder %v273_v22, 1  ;;  %vm282_vm15 = vcmp.lt.s32.totalorder %v1027_v17, 15  ;;  %vm1174_vm9 = vcmp.eq.s32.totalorder %v294_v24, 1 }
  0xb9   : > { %493 = vmatpush1.msra.mxu0 %v451_v13  ;;  %v308_v27 = vsel %vm307_vm6, %v304_v19, %v306_v18  ;;  %v309_v28 = vsel %vm307_vm6, %v306_v18, %v304_v19  ;;  %vm1178_vm0 = vcmp.eq.s32.totalorder %v298_v25, 1  ;;  %v245_v37 = vrot.slane %v241_v1, %v1015_v15 }
  0xba   : > { %494 = vmatprep.subr.mxu0 %v450_v20  ;;  %v326_v32 = vsel %vm1151_vm7, %v309_v28, 0.0  ;;  %v327_v33 = vsel %vm1155_vm10, %v308_v27, 0.0  ;;  %v249_v38 = vrot.slane %v241_v1, %v1013_v14  ;;  %vm229_vm4 = vcmp.lt.s32.totalorder %v1027_v17, 17 }
  0xbb   : > { %495 = vmatpush1.msra.mxu0 %v449_v23  ;;  %v257_v12 = vpop.permute.xlu1 %256  ;;  %v428_v41 = vrot.slane %v326_v32, 4  ;;  %v429_v42 = vrot.slane %v327_v33, 4  ;;  %vm250_vm2 = vcmp.eq.s32.totalorder %v245_v37, 1  ;;  %vm458_vm12 = vcmask 293888  }
  0xbc   : > { %v255_v29 = vpop.permute.xlu0 %254  ;;  %vm251_vm5 = vcmp.eq.s32.totalorder %v249_v38, 1 }
  0xbd   : > { %v259_v35 = vsel %vm258_vm1, %v255_v29, %v257_v12  ;;  %v260_v36 = vsel %vm258_vm1, %v257_v12, %v255_v29 }
  0xbe   : > { %v276_v45 = vsel %vm1161_vm11, %v260_v36, 0.0  ;;  %v277_v46 = vsel %vm1165_vm13, %v259_v35, 0.0 }
  0xbf   : > { %v281_v39 = vpop.permute.xlu1 %280  ;;  %v422_v51 = vrot.slane %v276_v45, 4  ;;  %v423_v52 = vrot.slane %v277_v46, 4 }
  0xc0   : > { %v279_v40 = vpop.permute.xlu0 %278 }
  0xc1   : > { %v283_v43 = vsel %vm282_vm15, %v279_v40, %v281_v39  ;;  %v284_v44 = vsel %vm282_vm15, %v281_v39, %v279_v40 }
  0xc2   : > { %v301_v47 = vsel %vm1174_vm9, %v284_v44, 0.0  ;;  %v302_v14 = vsel %vm1178_vm0, %v283_v43, 0.0 }
  0xc3   : > { %v448_v15 = vsel %vm444_vm8, %v302_v14, %v429_v42  ;;  %v447_v48 = vsel %vm444_vm8, %v301_v47, %v428_v41  ;;  %v226_v49 = vpop.permute.xlu1 %225 }
  0xc4   : > { %496 = vmatprep.subr.mxu0 %v448_v15  ;;  %v224_v50 = vpop.permute.xlu0 %223 }
  0xc5   : > { %v230_v53 = vsel %vm229_vm4, %v224_v50, %v226_v49  ;;  %v231_v54 = vsel %vm229_vm4, %v226_v49, %v224_v50  ;;  %497 = vmatpush1.msra.mxu0 %v447_v48 }
  0xc6   : > { %v252_v55 = vsel %vm250_vm2, %v231_v54, 0.0  ;;  %v253_v56 = vsel %vm251_vm5, %v230_v53, 0.0 }
  0xc7   : > { %v446_v57 = vsel %vm444_vm8, %v253_v56, %v423_v52  ;;  %v445_v58 = vsel %vm444_vm8, %v252_v55, %v422_v51 }
  0xc8   : > { %498 = vmatprep.subr.mxu0 %v446_v57 }
  0xc9   : > { %499 = vmatpush1.msra.mxu0 %v445_v58 }
  0xca   : > { %641 = vmatmul.mubr.msk.f32.vlgmr.msra.gmra.mxu0 %vm458_vm12, %v215_v59 }
  0xd1   : > { %v456_v60 = vpop.permute.xlu0 %455 }
 0x18a   : > { %v534_v17 = vpop.f32.mrf.mxu0 }
 0x18b   : > { %v535_v62 = vadd.f32 %v534_v17, %v456_v60 }
 0x18c   : > { %v536_v61 = vpop.f32.mrf.mxu0 }
 0x18d   : > { %v537_v63 = vadd.f32 %v536_v61, %v456_v60 }
 0x18f   : > { %v541_v3 = vcombine.low %v535_v62, %v537_v63 }
 0x191   : > { %543 = vst [vmem:[%s213_s12] sm:$0xff] %v541_v3 }
 0x192   : > { %748 = shalt.err (!%p745_p10)
}
 0x193   : > { %s749_s30 = scalar_lea.hbm %s557_s22, 128  ;;  %s753_s6 = scalar_lea.hbm %s1245_s4, 256 }
 0x194   : > { %p750_p2 = scmp.ne.s32.totalorder %s557_s22, %s749_s30  ;;  %p754_p7 = scmp.lt.s32.totalorder %s557_s22, %s1245_s4 }
 0x195   : > { %p755_p0 = scmp.lt.s32.totalorder %s753_s6, %s749_s30 }
 0x196   : > { %p751_p4 = pnand %p750_p2, %p1294_p12 }
 0x197   : > { %p756_p6 = por %p755_p0, %p754_p7 }
 0x198   : > { %p752_p9 = pneg %p751_p4 }
 0x19a   : > { %p757_p11 = pnand %p756_p6, %p752_p9 }
 0x19c   : > { %760 = shalt.err (!%p757_p11)
}
 0x19d   : > { %651 = dma.vmem_to_hbm [thread:$0]  (%p1294_p12), %s560_s26, 128, %s557_s22, %s545_s23  }
 0x19e PF: > { %s571_s8 = sand.u32 1, %s787_s15   ;;  %p1295_p13 = scmp.ne.s32.totalorder %s1252_s28, 0 }
 0x19f   : > { %p1296_p1 = scmp.ge.s32.totalorder %s799_s18, 2  ;;  %s572_s10 = scalar_lea.sflag [#allocation4], %s571_s8 }
 0x1a1   : > { %p658_p3 = pnand %p1296_p1, %p1295_p13 }
 0x1a3   : > { %p659_p5 = pneg %p658_p3 }
 0x1a5   : > { %782 = dma.done.wait (%p659_p5), %s572_s10, 128  }
 0x1a6   : > { %784 = vsyncadd (%p659_p5), %s572_s10, 4294967168  ;;  %p17_p8 = scmp.ge.s32.totalorder %s863_s21, 4   ;;  %s1297_s15 = smov %s791_s16 }
 0x1a7   : > { %s1298_s16 = smov %s795_s17  ;;  %s1299_s17 = smov %s875_s24 }
 0x1a8   : > { %s1300_s18 = smov %s863_s21  ;;  %19 = sbr.rel (!%p17_p8) target bundleno = 5 (0x5), region = 82 }
 0x1ad   :  { %577 = vsyncpa [#allocation3], 1 }
 0x1ae   :  { %579 = vsyncpa [#allocation3 + $0x1], 1 }
 0x1af   :  { %580 = vsyncpa [#allocation4], 1 }
 0x1b0   :  { %582 = vsyncpa [#allocation4 + $0x1], 1 }

</bundles_post_ra>
